<compile_context>
chip_gen: v6e
topology: v6e:2x2x1
jax: 0.10.0
libtpu: 0.0.40
codegen_flags: <defaults>
</compile_context>

<pallas_src>
import jax
import jax.numpy as jnp
from jax.experimental import pallas as pl
from jax.experimental.pallas import tpu as pltpu

IN_FEATURES = 3
HIDDEN = 8
AUG = IN_FEATURES + 1          # x augmented with a ones column (bias folded into matmul)
BLK = 16                       # instances per grid step: 16 * HIDDEN = 128 lanes (lane-dense)


# ---------------------------------------------------------------------------
# One-time prep (outside the per-call hot path)
# ---------------------------------------------------------------------------

def fuse_params(w1, b1, w2, b2):
    """Algebraically fuse the two Linear layers (PyTorch (out, in) weight
    convention) into a packed (AUG, HIDDEN) array: rows [0:3] = W1^T @ W2^T,
    row 3 = b1 @ W2^T + b2.  With a ones-augmented x, v2 = x_aug @ packed."""
    w1 = jnp.asarray(w1, jnp.float32)
    b1 = jnp.asarray(b1, jnp.float32)
    w2 = jnp.asarray(w2, jnp.float32)
    b2 = jnp.asarray(b2, jnp.float32)
    w_fused = w1.T @ w2.T                      # (3, 8)
    b_fused = b1 @ w2.T + b2                   # (8,)
    return jnp.concatenate([w_fused, b_fused[None, :]], axis=0)   # (4, 8)


def augment_x(x):
    """(B, 3) -> (B, 4) with a trailing ones column."""
    x = jnp.asarray(x, jnp.float32)
    return jnp.concatenate([x, jnp.ones((x.shape[0], 1), jnp.float32)], axis=-1)


def prep_inp(inp):
    """Scalar -> resident (1,1) f32 device array (done once, kept on device)."""
    return jnp.full((1, 1), inp, jnp.float32)


def build_batched_operands(x_all, packed):
    """x_all: (N, 8, 3), N multiple of BLK. Returns:
       x_lanes: (G, 8, BLK*AUG)  -- instance j of block g at lanes [AUG*j : AUG*(j+1)]
       p_bd:    (BLK*AUG, BLK*HIDDEN) block-diagonal fused params (shared by all blocks)
       mask:    (BLK*HIDDEN, BLK*HIDDEN) f32 0/1 block-diagonal mask for the 2nd matmul
    """
    x_all = jnp.asarray(x_all, jnp.float32)
    N = x_all.shape[0]
    assert N % BLK == 0, "batched path requires N to be a multiple of BLK"
    G = N // BLK
    ones = jnp.ones((N, HIDDEN, 1), jnp.float32)
    x_aug = jnp.concatenate([x_all, ones], axis=-1)                        # (N, 8, 4)
    x_lanes = (x_aug.reshape(G, BLK, HIDDEN, AUG)
                    .transpose(0, 2, 1, 3)
                    .reshape(G, HIDDEN, BLK * AUG))                        # (G, 8, 64)

    eye = jnp.eye(BLK, dtype=jnp.float32)
    p_bd = jnp.einsum('jk,fc->jfkc', eye, packed).reshape(BLK * AUG, BLK * HIDDEN)  # (64, 128)

    blk_id = jnp.arange(BLK * HIDDEN, dtype=jnp.int32) // HIDDEN
    mask = (blk_id[:, None] == blk_id[None, :]).astype(jnp.float32)        # (128, 128)
    return x_lanes, p_bd, mask


# ---------------------------------------------------------------------------
# Single-instance kernel (original module call shape)
# ---------------------------------------------------------------------------

def _fused_kernel(inp_ref, x_ref, p_ref, o_ref):
    # x_ref: (8, 4) ones-augmented x; p_ref: (4, 8) [W_fused ; b_fused]
    v2 = jnp.dot(x_ref[...], p_ref[...], preferred_element_type=jnp.float32)   # (8, 8)
    v3 = jnp.dot(v2, v2, preferred_element_type=jnp.float32)                   # (8, 8)
    o_ref[...] = inp_ref[0, 0] + v3


@jax.jit
def model_forward(x_aug, packed_params, inp_arr):
    """x_aug: (8, 4) f32; packed_params: (4, 8) f32; inp_arr: (1, 1) f32."""
    B = x_aug.shape[0]
    assert B == HIDDEN  # torch.mm(v2, v2) needs batch == hidden width
    return pl.pallas_call(
        _fused_kernel,
        out_shape=jax.ShapeDtypeStruct((B, B), jnp.float32),
        in_specs=[
            pl.BlockSpec(memory_space=pltpu.MemorySpace.SMEM),   # inp scalar (resident)
            pl.BlockSpec(memory_space=pltpu.MemorySpace.VMEM),   # ones-augmented x
            pl.BlockSpec(memory_space=pltpu.MemorySpace.VMEM),   # packed fused params
        ],
        out_specs=pl.BlockSpec(memory_space=pltpu.MemorySpace.VMEM),
    )(inp_arr, x_aug, packed_params)


# ---------------------------------------------------------------------------
# Batched kernel: BLK independent instances per grid step, lane-dense output
# ---------------------------------------------------------------------------

def _batched_kernel(inp_ref, x_ref, p_ref, m_ref, o_ref):
    #   x_ref: (1, 8, BLK*AUG)       lane-packed, ones-augmented inputs
    #   p_ref: (BLK*AUG, BLK*HIDDEN) block-diagonal fused params
    #   m_ref: (BLK*HIDDEN, BLK*HIDDEN) block-diagonal 0/1 mask
    #   o_ref: (1, 8, BLK*HIDDEN)    lane-dense (last dim 128) output slab
    x = x_ref[0]                                                        # (8, 64)
    v2 = jnp.dot(x, p_ref[...], preferred_element_type=jnp.float32)    # (8, 128) lane-packed v2
    # Per-instance v3_j = v2_j @ v2_j as ONE block-diagonal MXU matmul:
    #   rhs[a, b] = v2[a % 8, b] if a // 8 == b // 8 else 0
    rhs = jnp.tile(v2, (BLK, 1)) * m_ref[...]                           # (128, 128)
    v3 = jnp.dot(v2, rhs, preferred_element_type=jnp.float32)          # (8, 128) lane-packed v3
    o_ref[0] = inp_ref[0, 0] + v3


@jax.jit
def model_forward_batched(x_lanes, p_bd, mask, inp_arr):
    """x_lanes: (G, 8, BLK*AUG); p_bd: (BLK*AUG, BLK*HIDDEN);
       mask: (BLK*HIDDEN, BLK*HIDDEN); inp_arr: (1, 1). Returns (G*BLK, 8, 8)."""
    G = x_lanes.shape[0]
    out = pl.pallas_call(
        _batched_kernel,
        out_shape=jax.ShapeDtypeStruct((G, HIDDEN, BLK * HIDDEN), jnp.float32),
        grid=(G,),
        in_specs=[
            pl.BlockSpec(memory_space=pltpu.MemorySpace.SMEM),             # inp scalar
            pl.BlockSpec((1, HIDDEN, BLK * AUG), lambda g: (g, 0, 0)),     # inputs
            pl.BlockSpec((BLK * AUG, BLK * HIDDEN), lambda g: (0, 0)),     # block-diag params
            pl.BlockSpec((BLK * HIDDEN, BLK * HIDDEN), lambda g: (0, 0)),  # block-diag mask
        ],
        out_specs=pl.BlockSpec((1, HIDDEN, BLK * HIDDEN), lambda g: (g, 0, 0)),
        compiler_params=pltpu.CompilerParams(dimension_semantics=("parallel",)),
    )(inp_arr, x_lanes, p_bd, mask)
    # Unpack lanes back to per-instance (8, 8) results (layout plumbing only).
    out = out.reshape(G, HIDDEN, BLK, HIDDEN).transpose(0, 2, 1, 3)
    return out.reshape(G * BLK, HIDDEN, HIDDEN)


# ---------------------------------------------------------------------------

if __name__ == "__main__":
    key = jax.random.PRNGKey(0)
    kx, k1, kb1, k2, kb2, kxb = jax.random.split(key, 6)

    # Deterministic "Linear" parameters (PyTorch convention: weight is (out, in)).
    w1 = jax.random.normal(k1, (HIDDEN, IN_FEATURES), jnp.float32) * (1.0 / jnp.sqrt(IN_FEATURES))
    b1 = jax.random.normal(kb1, (HIDDEN,), jnp.float32) * 0.1
    w2 = jax.random.normal(k2, (HIDDEN, HIDDEN), jnp.float32) * (1.0 / jnp.sqrt(HIDDEN))
    b2 = jax.random.normal(kb2, (HIDDEN,), jnp.float32) * 0.1
    inp = 1.0

    # One-time prep (outside the hot path): fused params + resident scalar.
    packed = fuse_params(w1, b1, w2, b2)       # (4, 8)
    inp_arr = prep_inp(inp)                    # (1, 1) f32, stays on device
    jax.block_until_ready((packed, inp_arr))

    # --- 1) single-instance path (original module shape; batch must be 8) ---
    x = jax.random.normal(kx, (HIDDEN, IN_FEATURES), jnp.float32)   # (8, 3)
    x_aug = jax.block_until_ready(augment_x(x))                      # (8, 4)
    out1 = jax.block_until_ready(model_forward(x_aug, packed, inp_arr))

    v2s = (x @ w1.T + b1) @ w2.T + b2
    ref1 = inp + v2s @ v2s
    assert out1.shape == (HIDDEN, HIDDEN)
    assert jnp.allclose(out1, ref1, atol=1e-3, rtol=1e-3), "single-instance mismatch"

    # --- 2) batched path: 64 instances -> grid of 4 lane-dense (8,128) blocks ---
    N = 4 * BLK
    x_all = jax.random.normal(kxb, (N, HIDDEN, IN_FEATURES), jnp.float32)
    x_lanes, p_bd, mask = build_batched_operands(x_all, packed)
    jax.block_until_ready((x_lanes, p_bd, mask))

    out_b = jax.block_until_ready(model_forward_batched(x_lanes, p_bd, mask, inp_arr))

    v1b = jnp.einsum('nbi,oi->nbo', x_all, w1) + b1
    v2b = jnp.einsum('nbh,oh->nbo', v1b, w2) + b2
    ref_b = inp + jnp.einsum('nij,njk->nik', v2b, v2b)
    assert out_b.shape == (N, HIDDEN, HIDDEN)
    assert jnp.allclose(out_b, ref_b, atol=1e-3, rtol=1e-3), "batched mismatch"

    print("KERNEL_OK")
</pallas_src>

<mosaic_0001>
module attributes {stable_mosaic.version = 11 : i64} {
  func.func @_fused_kernel(%arg0: memref<1x1xf32, #tpu.memory_space<smem>>, %arg1: memref<8x4xf32, #tpu.memory_space<vmem>>, %arg2: memref<4x8xf32, #tpu.memory_space<vmem>>, %arg3: memref<8x8xf32, #tpu.memory_space<vmem>>) attributes {dimension_semantics = [], scalar_prefetch = 0 : i64, scratch_operands = 0 : i64, tpu.core_type = #tpu.core_type<tc>} {
    %c0 = arith.constant 0 : index
    %c0_0 = arith.constant 0 : index
    %0 = vector.load %arg1[%c0, %c0_0] : memref<8x4xf32, #tpu.memory_space<vmem>>, vector<8x4xf32>
    %c0_1 = arith.constant 0 : index
    %c0_2 = arith.constant 0 : index
    %1 = vector.load %arg2[%c0_1, %c0_2] : memref<4x8xf32, #tpu.memory_space<vmem>>, vector<4x8xf32>
    %cst = arith.constant dense<0.000000e+00> : vector<8x8xf32>
    %2 = tpu.matmul %0, %1, %cst {dimension_numbers = #tpu.dot_dimension_numbers<[1], [0], [0], [1], [0, 0, 1, 1], [], []>} : vector<8x4xf32>, vector<4x8xf32>, vector<8x8xf32> -> vector<8x8xf32>
    %cst_3 = arith.constant dense<0.000000e+00> : vector<8x8xf32>
    %3 = tpu.matmul %2, %2, %cst_3 {dimension_numbers = #tpu.dot_dimension_numbers<[1], [0], [0], [1], [0, 0, 1, 1], [], []>} : vector<8x8xf32>, vector<8x8xf32>, vector<8x8xf32> -> vector<8x8xf32>
    %c0_4 = arith.constant 0 : index
    %c0_5 = arith.constant 0 : index
    %4 = memref.load %arg0[%c0_4, %c0_5] : memref<1x1xf32, #tpu.memory_space<smem>>
    %5 = vector.broadcast %4 : f32 to vector<8x8xf32>
    %6 = arith.addf %5, %3 : vector<8x8xf32>
    %c0_6 = arith.constant 0 : index
    %c0_7 = arith.constant 0 : index
    %7 = vector.load %arg3[%c0_6, %c0_7] : memref<8x8xf32, #tpu.memory_space<vmem>>, vector<8x8xf32>
    tpu.vector_store %arg3[%c0_6, %c0_7], %6 {strides = array<i32>} : memref<8x8xf32, #tpu.memory_space<vmem>>, vector<8x8xf32>,
    return
  }
}

</mosaic_0001>

<bundles_post_ra>
// kernel: model_forward.1
= control target key start
LH: loop header
LB: loop body
LE: loop exit
PB: predicated region body
PF: predicated region fallthrough
CT: control target
= control target key end

     0   :  { %vm22_vm0 = vcmask 1043456   ;;  %v230_v2 = vmov 0.0   ;;  %vm231_vm1 = vmmov 0   ;;  %vm18_vm2 = vcmask 31744   ;;  %s265_s0 = inlined_call_operand.<no memory space> [shape: f32[1,1], index: 0, kind: input, shape index: {}]   ;;  %s266_s1 = inlined_call_operand.vmem [shape: f32[8,4], index: 1, kind: input, shape index: {}]   ;;  %s267_s2 = inlined_call_operand.vmem [shape: f32[4,8], index: 2, kind: input, shape index: {}]   ;;  %s268_s3 = inlined_call_operand.hbm [shape: f32[8,8], index: 3, kind: output, shape index: {}]  }
   0x1   :  { %v17_v0 = vld [vmem:[%s267_s2] sm:$0xf]  ;;  %195 = vmatprep.subr.mxu0 %v230_v2  ;;  %197 = vmatprep.mubr.msk.f32.mxu0 %vm231_vm1, %v230_v2 }
   0x2   :  { %v16_v1 = vld [vmem:[%s266_s1] sm:$0xff] }
   0x3   :  { %9 = vsyncpa [#allocation4], 0  ;;  %196 = vmatpush3.msk.msra.mxu0 %vm22_vm0, %v17_v0  ;;  %200 = vmatprep.subr.mxu1 %v230_v2  ;;  %vm96_vm3 = vcmask 64512   ;;  %v171_v5 = vstv %s265_s0  ;;  %s232_s1 = smov [#allocation3]  }
   0x4   :  { %198 = vmatmul.mubr.msk.f32.vlgmr.msra.gmra.mxu0 %vm18_vm2, %v16_v1  ;;  %202 = vmatprep.mubr.msk.f32.mxu1 %vm231_vm1, %v230_v2  ;;  %s180_s17 = sshll.u32 %s232_s1, 4  ;;  %s181_s17 = int_to_ptr.vmem [resolvable:$true] %s180_s17 }
   0x5   :  { %s208_s18 = scalar_lea.vmem %s181_s17, 128  ;;  %p213_p1 = scmp.lt.s32.totalorder %s181_s17, %s181_s17 }
   0x6   :  { %p209_p0 = scmp.ne.s32.totalorder %s181_s17, %s208_s18  ;;  %p214_p2 = scmp.lt.s32.totalorder %s208_s18, %s208_s18 }
   0x8   :  { %p215_p3 = por %p214_p2, %p213_p1 }
   0xa   :  { %p216_p4 = pnand %p215_p3, %p209_p0 }
  0xc4   :  { %v92_v3 = vpop.f32.mrf.mxu0 }
  0xc5   :  { %201 = vmatpush3.msra.mxu1 %v92_v3 }
  0xc6   :  { %v199_v4 = vpop.f32.mrf.mxu0  ;;  %203 = vmatmul.mubr.msk.f32.vlgmr.msra.gmra.mxu1 %vm96_vm3, %v92_v3 }
 0x186   :  { %v166_v6 = vpop.f32.mrf.mxu1 }
 0x187   :  { %v172_v7 = vadd.f32 %v171_v5, %v166_v6 }
 0x188   :  { %v204_v8 = vpop.f32.mrf.mxu1 }
 0x189   :  { %173 = vst.msk [vmem:[#allocation3] sm:$0xff] %vm96_vm3, %v172_v7 }
 0x18a   :  { %219 = shalt.err (!%p216_p4)
}
 0x18b   :  { %183 = dma.vmem_to_hbm [thread:$0]  %s181_s17, 128, %s268_s3, [#allocation4]  }
 0x18c   :  { %228 = dma.done.wait [#allocation4], 128  }
 0x18d   :  { %229 = vsyncadd [#allocation4], 4294967168 }
 0x18e   :  { %187 = vsyncpa [#allocation4], 1 }

</bundles_post_ra>
